<compile_context>
chip_gen: v7x
topology: tpu7x:2x2x1
jax: 0.10.0
libtpu: 0.0.40
codegen_flags: <defaults>
</compile_context>

<pallas_src>
import functools

import jax
import jax.numpy as jnp
from jax.experimental import pallas as pl
from jax.experimental.pallas import tpu as pltpu


def _round_up(n, m):
    return ((n + m - 1) // m) * m


def _dbm_fused_kernel(x_ref, w_ref, b_ref, u_ref, o_ref, h_scr, *, n_out):
    """One grid step == one RBM layer:  h <- bernoulli(sigmoid(h @ W + b))."""
    layer = pl.program_id(0)

    # Layer 0: load the (padded, binary) visible units into the resident
    # VMEM activation buffer.
    @pl.when(layer == 0)
    def _():
        h_scr[...] = x_ref[...]

    # logits = h @ W + b   (bf16 operands, f32 accumulation on the MXU)
    logits = jnp.dot(h_scr[...], w_ref[0], preferred_element_type=jnp.float32)
    logits = logits + b_ref[0]                    # (1, pad_dim) broadcasts over batch
    p = jax.nn.sigmoid(logits)

    # bernoulli(p): compare against this layer's uniforms in [0, 1).
    h_new = (u_ref[0] < p).astype(h_scr.dtype)    # binary {0,1}, lossless in bf16
    h_scr[...] = h_new

    # Final layer: emit the un-padded sample (lane-aligned static slice).
    @pl.when(layer == pl.num_programs(0) - 1)
    def _():
        o_ref[...] = h_new[:, :n_out].astype(o_ref.dtype)


def dbm_forward_fused(x_pad, w_stack, b_stack, uniforms, n_out):
    """Run all RBM layers in a single Pallas call."""
    num_layers, pad_dim, _ = w_stack.shape
    B = x_pad.shape[0]

    grid_spec = pltpu.PrefetchScalarGridSpec(
        num_scalar_prefetch=0,
        grid=(num_layers,),
        in_specs=[
            pl.BlockSpec((B, pad_dim), lambda i: (0, 0)),              # x (used at layer 0)
            pl.BlockSpec((1, pad_dim, pad_dim), lambda i: (i, 0, 0)),  # W_i  (auto double-buffered)
            pl.BlockSpec((1, 1, pad_dim), lambda i: (i, 0, 0)),        # h_bias_i
            pl.BlockSpec((1, B, pad_dim), lambda i: (i, 0, 0)),        # uniforms_i
        ],
        out_specs=pl.BlockSpec((B, n_out), lambda i: (0, 0)),
        scratch_shapes=[pltpu.VMEM((B, pad_dim), jnp.bfloat16)],       # resident h
    )

    return pl.pallas_call(
        functools.partial(_dbm_fused_kernel, n_out=n_out),
        out_shape=jax.ShapeDtypeStruct((B, n_out), jnp.float32),
        grid_spec=grid_spec,
        compiler_params=pltpu.CompilerParams(
            # Layers are sequentially dependent -> reduction-style axis.
            dimension_semantics=("arbitrary",)),
    )(x_pad, w_stack, b_stack, uniforms)


class DeepBoltzmannMachine:
    """JAX/Pallas port of the PyTorch DeepBoltzmannMachine forward pass."""

    def __init__(self, layers, key):
        self.layers = list(layers)
        self.num_rbms = len(layers) - 1
        # Pad every layer width to a lane-aligned common size so all weights
        # share one (pad_dim, pad_dim) tile and can be stacked + streamed by a
        # single BlockSpec.  Zero-padding keeps the math exact (see kernel).
        self.pad_dim = max(128, _round_up(max(layers), 128))

        w_stack = jnp.zeros(
            (self.num_rbms, self.pad_dim, self.pad_dim), dtype=jnp.float32)
        for i in range(self.num_rbms):
            key, sub = jax.random.split(key)
            # matches torch.randn(n_visible, n_hidden) * 0.1
            w = 0.1 * jax.random.normal(
                sub, (layers[i], layers[i + 1]), dtype=jnp.float32)
            w_stack = w_stack.at[i, :layers[i], :layers[i + 1]].set(w)
        # Pre-cast ONCE (perf review): bf16 weights for the MXU matmul.
        self.w_stack = w_stack.astype(jnp.bfloat16)
        # h_bias initialised to zero (matches nn.Parameter(torch.zeros(n_hidden))).
        self.b_stack = jnp.zeros(
            (self.num_rbms, 1, self.pad_dim), dtype=jnp.float32)

    def forward(self, x, key):
        B, n_vis = x.shape
        assert n_vis == self.layers[0]
        # Zero-pad visible units to pad_dim; binary {0,1} -> bf16 is lossless.
        x_pad = jnp.zeros((B, self.pad_dim), dtype=jnp.bfloat16)
        x_pad = x_pad.at[:, :n_vis].set(x.astype(jnp.bfloat16))
        # Per-layer uniforms for the bernoulli draws (fresh key per forward,
        # unlike torch's implicit global RNG -- deterministic given `key`).
        uniforms = jax.random.uniform(
            key, (self.num_rbms, B, self.pad_dim), dtype=jnp.float32)
        return dbm_forward_fused(
            x_pad, self.w_stack, self.b_stack, uniforms, self.layers[-1])


if __name__ == "__main__":
    key = jax.random.PRNGKey(0)
    key, kx, kp, ks = jax.random.split(key, 4)

    # Small shapes consistent with the module: batch=8, layers [128, 256, 128].
    layers = [128, 256, 128]
    batch = 8

    # Binary visible units (what an RBM normally sees).
    x = (jax.random.uniform(kx, (batch, layers[0])) < 0.5).astype(jnp.float32)

    dbm = DeepBoltzmannMachine(layers, kp)
    h = dbm.forward(x, ks)
    h = jax.block_until_ready(h)

    assert h.shape == (batch, layers[-1])
    assert h.dtype == jnp.float32
    # Samples must be binary.
    assert bool(jnp.all((h == 0.0) | (h == 1.0)))

    print("KERNEL_OK")
</pallas_src>

<mosaic_0001>
module attributes {stable_mosaic.version = 11 : i64} {
  func.func @_dbm_fused_kernel(%arg0: i32, %arg1: memref<8x256xbf16, #tpu.memory_space<vmem>>, %arg2: memref<1x256x256xbf16, #tpu.memory_space<vmem>>, %arg3: memref<1x1x256xf32, #tpu.memory_space<vmem>>, %arg4: memref<1x8x256xf32, #tpu.memory_space<vmem>>, %arg5: memref<8x128xf32, #tpu.memory_space<vmem>>, %arg6: memref<8x256xbf16, #tpu.memory_space<vmem>>) attributes {dimension_semantics = [#tpu.dimension_semantics<arbitrary>], iteration_bounds = array<i64: 2>, scalar_prefetch = 0 : i64, scratch_operands = 1 : i64, tpu.core_type = #tpu.core_type<tc>, window_params = [{pipeline_mode = #tpu.pipeline_mode<synchronous>, transform_indices = @transform_0, window_bounds = array<i64: 8, 256>}, {transform_indices = @transform_1, window_bounds = array<i64: 1, 256, 256>}, {transform_indices = @transform_2, window_bounds = array<i64: 1, 1, 256>}, {transform_indices = @transform_3, window_bounds = array<i64: 1, 8, 256>}, {pipeline_mode = #tpu.pipeline_mode<synchronous>, transform_indices = @transform_4, window_bounds = array<i64: 8, 128>}]} {
    %c0_i32 = arith.constant 0 : i32
    %0 = arith.cmpi eq, %arg0, %c0_i32 : i32
    %1 = arith.extui %0 : i1 to i32
    %c0_i32_0 = arith.constant 0 : i32
    %2 = arith.cmpi ne, %1, %c0_i32_0 : i32
    scf.if %2 {
      %c0_15 = arith.constant 0 : index
      %c0_16 = arith.constant 0 : index
      %26 = vector.load %arg1[%c0_15, %c0_16] : memref<8x256xbf16, #tpu.memory_space<vmem>>, vector<8x256xbf16>
      %c0_17 = arith.constant 0 : index
      %c0_18 = arith.constant 0 : index
      %27 = vector.load %arg6[%c0_17, %c0_18] : memref<8x256xbf16, #tpu.memory_space<vmem>>, vector<8x256xbf16>
      tpu.vector_store %arg6[%c0_17, %c0_18], %26 {strides = array<i32>} : memref<8x256xbf16, #tpu.memory_space<vmem>>, vector<8x256xbf16>,
    } else {
    }
    %c0 = arith.constant 0 : index
    %c0_1 = arith.constant 0 : index
    %3 = vector.load %arg6[%c0, %c0_1] : memref<8x256xbf16, #tpu.memory_space<vmem>>, vector<8x256xbf16>
    %c0_2 = arith.constant 0 : index
    %c0_3 = arith.constant 0 : index
    %c0_4 = arith.constant 0 : index
    %4 = vector.load %arg2[%c0_2, %c0_3, %c0_4] : memref<1x256x256xbf16, #tpu.memory_space<vmem>>, vector<1x256x256xbf16>
    %5 = vector.shape_cast %4 : vector<1x256x256xbf16> to vector<256x256xbf16>
    %cst = arith.constant dense<0.000000e+00> : vector<8x256xf32>
    %6 = tpu.matmul %3, %5, %cst {dimension_numbers = #tpu.dot_dimension_numbers<[1], [0], [0], [1], [0, 0, 1, 1], [], []>} : vector<8x256xbf16>, vector<256x256xbf16>, vector<8x256xf32> -> vector<8x256xf32>
    %c0_5 = arith.constant 0 : index
    %c0_6 = arith.constant 0 : index
    %c0_7 = arith.constant 0 : index
    %7 = vector.load %arg3[%c0_5, %c0_6, %c0_7] : memref<1x1x256xf32, #tpu.memory_space<vmem>>, vector<1x1x256xf32>
    %8 = vector.shape_cast %7 : vector<1x1x256xf32> to vector<1x256xf32>
    %9 = vector.broadcast %8 : vector<1x256xf32> to vector<8x256xf32>
    %10 = arith.addf %6, %9 : vector<8x256xf32>
    %11 = arith.negf %10 : vector<8x256xf32>
    %12 = math.exp %11 : vector<8x256xf32>
    %cst_8 = arith.constant 1.000000e+00 : f32
    %13 = vector.broadcast %cst_8 : f32 to vector<8x256xf32>
    %14 = arith.addf %13, %12 : vector<8x256xf32>
    %15 = arith.divf %13, %14 : vector<8x256xf32>
    %c0_9 = arith.constant 0 : index
    %c0_10 = arith.constant 0 : index
    %c0_11 = arith.constant 0 : index
    %16 = vector.load %arg4[%c0_9, %c0_10, %c0_11] : memref<1x8x256xf32, #tpu.memory_space<vmem>>, vector<1x8x256xf32>
    %17 = vector.shape_cast %16 : vector<1x8x256xf32> to vector<8x256xf32>
    %18 = arith.cmpf olt, %17, %15 : vector<8x256xf32>
    %19 = arith.extui %18 : vector<8x256xi1> to vector<8x256xi32>
    %20 = arith.sitofp %19 : vector<8x256xi32> to vector<8x256xf32>
    %21 = arith.truncf %20 : vector<8x256xf32> to vector<8x256xbf16>
    %c0_12 = arith.constant 0 : index
    %c0_13 = arith.constant 0 : index
    %22 = vector.load %arg6[%c0_12, %c0_13] : memref<8x256xbf16, #tpu.memory_space<vmem>>, vector<8x256xbf16>
    tpu.vector_store %arg6[%c0_12, %c0_13], %21 {strides = array<i32>} : memref<8x256xbf16, #tpu.memory_space<vmem>>, vector<8x256xbf16>,
    %c1_i32 = arith.constant 1 : i32
    %23 = arith.cmpi eq, %arg0, %c1_i32 : i32
    %24 = arith.extui %23 : i1 to i32
    %c0_i32_14 = arith.constant 0 : i32
    %25 = arith.cmpi ne, %24, %c0_i32_14 : i32
    scf.if %25 {
      %26 = vector.extract_strided_slice %21 {offsets = [0, 0], sizes = [8, 128], strides = [1, 1]} : vector<8x256xbf16> to vector<8x128xbf16>
      %27 = arith.extf %26 : vector<8x128xbf16> to vector<8x128xf32>
      %c0_15 = arith.constant 0 : index
      %c0_16 = arith.constant 0 : index
      %28 = vector.load %arg5[%c0_15, %c0_16] : memref<8x128xf32, #tpu.memory_space<vmem>>, vector<8x128xf32>
      tpu.vector_store %arg5[%c0_15, %c0_16], %27 {strides = array<i32>} : memref<8x128xf32, #tpu.memory_space<vmem>>, vector<8x128xf32>,
    } else {
    }
    return
  }
  func.func @transform_0(%arg0: i32) -> (i32, i32) {
    %c0_i32 = arith.constant 0 : i32
    %c0_i32_0 = arith.constant 0 : i32
    %c0_i32_1 = arith.constant 0 : i32
    return %c0_i32, %c0_i32_0 : i32, i32
  }
  func.func @transform_1(%arg0: i32) -> (i32, i32, i32) {
    %c0_i32 = arith.constant 0 : i32
    %c0_i32_0 = arith.constant 0 : i32
    %c0_i32_1 = arith.constant 0 : i32
    return %arg0, %c0_i32, %c0_i32_0 : i32, i32, i32
  }
  func.func @transform_2(%arg0: i32) -> (i32, i32, i32) {
    %c0_i32 = arith.constant 0 : i32
    %c0_i32_0 = arith.constant 0 : i32
    %c0_i32_1 = arith.constant 0 : i32
    return %arg0, %c0_i32, %c0_i32_0 : i32, i32, i32
  }
  func.func @transform_3(%arg0: i32) -> (i32, i32, i32) {
    %c0_i32 = arith.constant 0 : i32
    %c0_i32_0 = arith.constant 0 : i32
    %c0_i32_1 = arith.constant 0 : i32
    return %arg0, %c0_i32, %c0_i32_0 : i32, i32, i32
  }
  func.func @transform_4(%arg0: i32) -> (i32, i32) {
    %c0_i32 = arith.constant 0 : i32
    %c0_i32_0 = arith.constant 0 : i32
    %c0_i32_1 = arith.constant 0 : i32
    return %c0_i32, %c0_i32_0 : i32, i32
  }
}

</mosaic_0001>

<bundles_post_ra>
// kernel: tpu_custom_call.1
= control target key start
LH: loop header
LB: loop body
LE: loop exit
PB: predicated region body
PF: predicated region fallthrough
CT: control target
= control target key end

     0   :  { %9 = vsyncpa [#allocation4], 0  ;;  %s1294_s0 = inlined_call_operand.hbm [shape: bf16[8,256], index: 0, kind: input, shape index: {}]   ;;  %s1295_s1 = inlined_call_operand.hbm [shape: bf16[2,256,256], index: 1, kind: input, shape index: {}]   ;;  %s1296_s2 = inlined_call_operand.vmem [shape: f32[2,1,256], index: 2, kind: input, shape index: {}]   ;;  %s1297_s3 = inlined_call_operand.hbm [shape: f32[2,8,256], index: 3, kind: input, shape index: {}]   ;;  %s1298_s4 = inlined_call_operand.hbm [shape: f32[8,128], index: 4, kind: output, shape index: {}]  }
   0x1   :  { %10 = vsyncpa [#allocation7], 0 }
   0x2   :  { %12 = vsyncpa [#allocation7 + $0x1], 0 }
   0x3   :  { %13 = vsyncpa [#allocation5], 0  ;;  %s1040_s15 = smov 0   ;;  %s1042_s16 = smov 0  }
   0x4   :  { %s1044_s17 = smov 0   ;;  %s1046_s18 = smov 0  }
   0x5 LB: > { %s1061_s19 = sadd.s32 1, %s1006_s18   ;;  %s47_s20 = sadd.s32 1, %s1002_s17  ;;  %s1006_s18 = sphi %s1046_s18, %s1320_s18   ;;  %s1002_s17 = sphi %s1044_s17, %s1319_s17   ;;  %s998_s16 = sphi %s1042_s16, %s1318_s16   ;;  %s994_s15 = sphi %s1040_s15, %s1317_s15  }
   0x6   : > { %s44_s21 = ssub.s32 %s1006_s18, %s1061_s19  ;;  %p54_p0 = scmp.ne.s32.totalorder %s1002_s17, %s998_s16 }
   0x7   : > { %p45_p1 = scmp.eq.s32.totalorder %s44_s21, 0  ;;  %p55_p2 = scmp.eq.s32.totalorder %s1006_s18, 0 }
   0x8   : > { %p751_p3 = scmp.lt.s32.totalorder %s1006_s18, 2  ;;  %s168_s23 = sand.u32 1, %s1006_s18  }
   0x9   : > { %s1071_s22 = scalar_select %p45_p1, %s1002_s17, %s47_s20  }
   0xa   : > { %p56_p4 = por %p55_p2, %p54_p0  ;;  %s170_s24 = sand.u32 1, %s1002_s17  }
   0xb   : > { %s668_s25 = sshll.u32 %s170_s24, 8  ;;  %s724_s26 = sshll.u32 %s1006_s18, 12 }
   0xc   : > { %s1081_s29 = scalar_lea.hbm %s1295_s1, %s724_s26  ;;  %s172_s30 = scalar_lea.vmem [#allocation6], %s668_s25 }
   0xd   : > { %s179_s5 = sshll.u32 %s172_s30, 4  ;;  %p1083_p5 = pnand %p751_p3, %p56_p4  ;;  %s1087_s5 = int_to_ptr.vmem [resolvable:$true] %s179_s5 }
   0xe   : > { %s1089_s7 = scalar_lea.sflag [#allocation7], %s168_s23  ;;  %s850_s8 = scalar_lea.hbm %s1081_s29, 4096 }
   0xf   : > { %s1305_s6 = scalar_select %p1083_p5, 1, 0 }
  0x10   : > { %p851_p6 = scmp.ne.s32.totalorder %s1081_s29, %s850_s8  ;;  %p1300_p7 = pneg %p1083_p5 }
  0x11   : > { %s855_s11 = scalar_lea.hbm %s1295_s1, 8192  ;;  %p856_p10 = scmp.lt.u32.totalorder %s1081_s29, %s1295_s1 }
  0x12   : > { %p853_p8 = pnand %p1300_p7, %p851_p6  ;;  %p857_p11 = scmp.lt.u32.totalorder %s855_s11, %s850_s8 }
  0x13   : > { %p859_p13 = scmp.lt.u32.totalorder %s850_s8, %s1081_s29 }
  0x14   : > { %p854_p9 = pneg %p853_p8  ;;  %p858_p12 = por %p857_p11, %p856_p10 }
  0x16   : > { %p860_p0 = por %p859_p13, %p858_p12 }
  0x18   : > { %p861_p1 = pnand %p860_p0, %p854_p9 }
  0x1a   : > { %864 = shalt.err (!%p861_p1)
}
  0x1b   : > { %s865_s14 = scalar_lea.vmem %s1087_s5, 4096  ;;  %s1008_s20 = smov [#allocation6]  }
  0x1c   : > { %p866_p2 = scmp.ne.s32.totalorder %s1087_s5, %s865_s14  ;;  %s870_s21 = sshll.u32 %s1008_s20, 4  ;;  %s871_s21 = int_to_ptr.vmem [resolvable:$false] %s870_s21 }
  0x1d   : > { %s872_s23 = scalar_lea.vmem %s871_s21, 8192  ;;  %p873_p6 = scmp.lt.s32.totalorder %s1087_s5, %s871_s21 }
  0x1e   : > { %p868_p3 = pnand %p866_p2, %p1300_p7  ;;  %p874_p8 = scmp.lt.s32.totalorder %s872_s23, %s865_s14 }
  0x20   : > { %p869_p4 = pneg %p868_p3  ;;  %p875_p10 = por %p874_p8, %p873_p6 }
  0x22   : > { %p876_p11 = pnand %p875_p10, %p869_p4 }
  0x24   : > { %879 = shalt.err (!%p876_p11)
}
  0x25   : > { %s1009_s25 = smov 128   ;;  %s1010_s26 = smov 8  }
  0x26   : > { %746 = dma.hbm_to_vmem [thread:$0]  (!%p1083_p5), %s1081_s29, 4096, %s1087_s5, %s1089_s7, %s1009_s25, %s1009_s25, %s1010_s26  }
  0x27   : > { %s1118_s27 = sadd.s32 4294967295, %s1006_s18   ;;  %p60_p12 = scmp.ne.s32.totalorder %s998_s16, %s994_s15 }
  0x28   : > { %p1299_p9 = scmp.eq.s32.totalorder %s1118_s27, 0  ;;  %p665_p13 = scmp.ge.s32.totalorder %s1006_s18, 1 }
  0x29   : > { %p144_p0 = scmp.lt.s32.totalorder %s1006_s18, 3  ;;  %s1011_s29 = smov [#allocation3]  }
  0x2a   : > { %p1128_p2 = por %p1299_p9, %p60_p12  ;;  %s157_s5 = sshll.u32 %s1011_s29, 4  ;;  %s158_s5 = int_to_ptr.vmem [resolvable:$true] %s157_s5 }
  0x2b   : > { %p1132_p3 = pnand %p665_p13, %p144_p0  ;;  %s671_s8 = sshll.u32 %s170_s24, 4 }
  0x2c   : > { %s1306_s28 = scalar_select %p1128_p2, 1, 0 }
  0x2d   : > { %s1307_s30 = scalar_select %p1132_p3, 1, 0 }
  0x2e   : > { %p739_p4 = pneg %p1132_p3  ;;  %s725_s15 = sshll.u32 %s1006_s18, 8 }
  0x2f   : > { %s200_s9 = scalar_lea.vmem [#allocation8], %s671_s8  ;;  %s1150_s14 = scalar_lea.hbm %s1297_s3, %s725_s15 }
  0x30   : > { %s208_s10 = sshll.u32 %s200_s9, 4  ;;  %p1143_p6 = pnand %p739_p4, %p1299_p9  ;;  %s1152_s10 = int_to_ptr.vmem [resolvable:$true] %s208_s10 }
  0x31   : > { %s880_s18 = scalar_lea.hbm %s1294_s0, 128 }
  0x32   : > { %p881_p8 = scmp.ne.s32.totalorder %s1294_s0, %s880_s18  ;;  %p882_p10 = pneg %p1143_p6 }
  0x33   : > { %p887_p13 = scmp.lt.u32.totalorder %s880_s18, %s1294_s0 }
  0x34   : > { %p883_p11 = pnand %p882_p10, %p881_p8 }
  0x36   : > { %p884_p12 = pneg %p883_p11 }
  0x38   : > { %p889_p0 = pnand %p887_p13, %p884_p12 }
  0x3a   : > { %892 = shalt.err (!%p889_p0)
}
  0x3b   : > { %s893_s29 = scalar_lea.vmem %s158_s5, 128  ;;  %p901_p7 = scmp.lt.s32.totalorder %s158_s5, %s158_s5 }
  0x3c   : > { %p894_p4 = scmp.ne.s32.totalorder %s158_s5, %s893_s29  ;;  %p902_p2 = scmp.lt.s32.totalorder %s893_s29, %s893_s29 }
  0x3e   : > { %p896_p1 = pnand %p894_p4, %p882_p10  ;;  %p903_p3 = por %p902_p2, %p901_p7 }
  0x40   : > { %p897_p9 = pneg %p896_p1 }
  0x42   : > { %p904_p5 = pnand %p903_p3, %p897_p9 }
  0x44   : > { %907 = shalt.err (!%p904_p5)
}
  0x45   : > { %742 = dma.hbm_to_vmem [thread:$0]  (!%p1143_p6), %s1294_s0, 128, %s158_s5, [#allocation4]  }
  0x46   : > { %s908_s9 = scalar_lea.hbm %s1150_s14, 256  ;;  %p1309_p10 = scmp.ne.s32.totalorder %s1305_s6, 0 }
  0x47   : > { %p909_p8 = scmp.ne.s32.totalorder %s1150_s14, %s908_s9  ;;  %s913_s24 = scalar_lea.hbm %s1297_s3, 512 }
  0x48   : > { %p1310_p1 = pneg %p1309_p10  ;;  %p914_p5 = scmp.lt.u32.totalorder %s1150_s14, %s1297_s3 }
  0x49   : > { %p915_p7 = scmp.lt.u32.totalorder %s913_s24, %s908_s9  ;;  %p917_p2 = scmp.lt.u32.totalorder %s908_s9, %s1150_s14 }
  0x4a   : > { %p911_p11 = pnand %p909_p8, %p1310_p1 }
  0x4b   : > { %p916_p9 = por %p915_p7, %p914_p5 }
  0x4c   : > { %p912_p12 = pneg %p911_p11 }
  0x4d   : > { %p918_p3 = por %p917_p2, %p916_p9 }
  0x4f   : > { %p919_p13 = pnand %p918_p3, %p912_p12 }
  0x51   : > { %922 = shalt.err (!%p919_p13)
}
  0x52   : > { %s923_s5 = scalar_lea.vmem %s1152_s10, 256  ;;  %p1311_p0 = pmov %p1310_p1 }
  0x53   : > { %p924_p6 = scmp.ne.s32.totalorder %s1152_s10, %s923_s5  ;;  %s1012_s18 = smov [#allocation8]  }
  0x54   : > { %s928_s21 = sshll.u32 %s1012_s18, 4  ;;  %s929_s21 = int_to_ptr.vmem [resolvable:$false] %s928_s21 }
  0x55   : > { %p926_p4 = pnand %p924_p6, %p1311_p0  ;;  %s930_s23 = scalar_lea.vmem %s929_s21, 512 }
  0x56   : > { %p931_p1 = scmp.lt.s32.totalorder %s1152_s10, %s929_s21  ;;  %p932_p11 = scmp.lt.s32.totalorder %s930_s23, %s923_s5 }
  0x57   : > { %p927_p8 = pneg %p926_p4 }
  0x58   : > { %p933_p5 = por %p932_p11, %p931_p1 }
  0x5a   : > { %p934_p7 = pnand %p933_p5, %p927_p8 }
  0x5c   : > { %937 = shalt.err (!%p934_p7)
}
  0x5d   : > { %749 = dma.hbm_to_vmem [thread:$0]  (!%p1309_p10), %s1150_s14, 256, %s1152_s10, %s1089_s7  }
  0x5e   : > { %p1312_p12 = scmp.ne.s32.totalorder %s1307_s30, 0 }
  0x5f   : > { %p1313_p9 = scmp.eq.s32.totalorder (!%p1312_p12), %s1118_s27, 0 }
  0x60   : > { %217 = sbr.rel (%p1312_p12) target bundleno = 455 (0x1c7), region = 36 }
  0x67   : > { %981 = dma.done.wait (%p1313_p9), [#allocation4], 128   ;;  %p1314_p2 = pmov %p1313_p9 }
  0x68   : > { %s223_s25 = sand.u32 1, %s1118_s27   ;;  %s225_s26 = sand.u32 1, %s998_s16  }
  0x69   : > { %983 = vsyncadd (%p1314_p2), [#allocation4], 4294967168  ;;  %s676_s29 = sshll.u32 %s225_s26, 8  ;;  %s224_s6 = scalar_lea.sflag [#allocation7], %s223_s25 }
  0x6a   : > { %s1202_s8 = scalar_lea.vmem [#allocation6], %s676_s29  ;;  %p1315_p3 = scmp.ne.s32.totalorder %s1306_s28, 0 }
  0x6c   : > { %985 = dma.done.wait (%p1315_p3), %s224_s6, 4352  }
  0x6d   : > { %987 = vsyncadd (%p1315_p3), %s224_s6, 4294962944  ;;  %s1208_s7 = sshll.u32 %s225_s26, 4  ;;  %p265_p10 = scmp.lt.s32.totalorder %s1118_s27, 1 }
  0x6e   : > { %s236_s12 = scalar_lea.vmem [#allocation8], %s1208_s7  ;;  %p1316_p13 = scmp.ne.s32.totalorder %s1118_s27, 0 }
  0x6f   : > { %s266_s30 = scalar_select %p265_p10, %s1118_s27, 1 }
  0x70   : > { %272 = sbr.rel (%p1316_p13) target bundleno = 119 (0x77), region = 52  ;;  %v273_v0 = vld [vmem:[#allocation3] sm:$0xff] (!%p1316_p13) }
  0x71   : > { %s678_s10 = sshll.u32 %s266_s30, 1  ;;  %274 = vst [vmem:[#allocation2] sm:$0xff] (!%p1316_p13), %v273_v0 }
  0x72   : > { %s1215_s9 = scalar_lea.vmem %s1296_s2, %s678_s10 }
  0x77 PF: > { %v792_v1 = vld [vmem:[%s1202_s8 + $0x4] ss:$8 sps:$4 sm:$0xff]   ;;  %v794_v2 = vld [vmem:[%s1202_s8] ss:$8 sps:$4 sm:$0xff]   ;;  %v795_v3 = vld [vmem:[%s1202_s8 + $0x14] ss:$8 sps:$4 sm:$0xff]   ;;  %v310_v36 = vlaneseq }
  0x78   : > { %487 = vmatprep.subr.bf16.mxu0 %v792_v1  ;;  %v797_v4 = vld [vmem:[%s1202_s8 + $0x10] ss:$8 sps:$4 sm:$0xff]   ;;  %v798_v5 = vld [vmem:[%s1202_s8 + $0x24] ss:$8 sps:$4 sm:$0xff]   ;;  %v800_v6 = vld [vmem:[%s1202_s8 + $0x20] ss:$8 sps:$4 sm:$0xff]  }
  0x79   : > { %488 = vmatpush1.bf16.msra.mxu0 %v794_v2  ;;  %v801_v7 = vld [vmem:[%s1202_s8 + $0x34] ss:$8 sps:$4 sm:$0xff]   ;;  %v803_v8 = vld [vmem:[%s1202_s8 + $0x30] ss:$8 sps:$4 sm:$0xff]   ;;  %v804_v9 = vld [vmem:[%s1202_s8 + $0x44] ss:$8 sps:$4 sm:$0xff]  }
  0x7a   : > { %489 = vmatprep.subr.bf16.mxu0 %v795_v3  ;;  %v806_v10 = vld [vmem:[%s1202_s8 + $0x40] ss:$8 sps:$4 sm:$0xff]   ;;  %v807_v11 = vld [vmem:[%s1202_s8 + $0x54] ss:$8 sps:$4 sm:$0xff]   ;;  %v809_v12 = vld [vmem:[%s1202_s8 + $0x50] ss:$8 sps:$4 sm:$0xff]  }
  0x7b   : > { %v810_v13 = vld [vmem:[%s1202_s8 + $0x64] ss:$8 sps:$4 sm:$0xff]   ;;  %v275_v14 = vld [vmem:[#allocation2] sm:$0xff]  ;;  %v812_v16 = vld [vmem:[%s1202_s8 + $0x60] ss:$8 sps:$4 sm:$0xff]   ;;  %v311_v37 = vshrl.u32 %v310_v36, 7 }
  0x7c   : > { %v681_v15 = vcombine.high %v275_v14, %v275_v14  ;;  %v813_v17 = vld [vmem:[%s1202_s8 + $0x74] ss:$8 sps:$4 sm:$0xff]   ;;  %v815_v18 = vld [vmem:[%s1202_s8 + $0x70] ss:$8 sps:$4 sm:$0xff]   ;;  %v816_v19 = vld [vmem:[%s1202_s8 + $0x84] ss:$8 sps:$4 sm:$0xff]   ;;  %v680_v35 = vcombine.low %v275_v14, %v275_v14 }
  0x7d   : > { %490 = vmatpush1.bf16.msra.mxu0 %v797_v4  ;;  %v818_v20 = vld [vmem:[%s1202_s8 + $0x80] ss:$8 sps:$4 sm:$0xff]   ;;  %v819_v21 = vld [vmem:[%s1202_s8 + $0x94] ss:$8 sps:$4 sm:$0xff]   ;;  %v821_v22 = vld [vmem:[%s1202_s8 + $0x90] ss:$8 sps:$4 sm:$0xff]  }
  0x7e   : > { %491 = vmatprep.subr.bf16.mxu0 %v798_v5  ;;  %519 = vmatprep.mubr.bf16.mxu0 %v681_v15  ;;  %v822_v23 = vld [vmem:[%s1202_s8 + $0xa4] ss:$8 sps:$4 sm:$0xff]   ;;  %v824_v24 = vld [vmem:[%s1202_s8 + $0xa0] ss:$8 sps:$4 sm:$0xff]   ;;  %v825_v25 = vld [vmem:[%s1202_s8 + $0xb4] ss:$8 sps:$4 sm:$0xff]  }
  0x7f   : > { %v827_v26 = vld [vmem:[%s1202_s8 + $0xb0] ss:$8 sps:$4 sm:$0xff]   ;;  %v828_v27 = vld [vmem:[%s1202_s8 + $0xc4] ss:$8 sps:$4 sm:$0xff]   ;;  %v830_v28 = vld [vmem:[%s1202_s8 + $0xc0] ss:$8 sps:$4 sm:$0xff]  }
  0x80   : > { %v831_v29 = vld [vmem:[%s1202_s8 + $0xd4] ss:$8 sps:$4 sm:$0xff]   ;;  %v833_v30 = vld [vmem:[%s1202_s8 + $0xd0] ss:$8 sps:$4 sm:$0xff]   ;;  %v834_v31 = vld [vmem:[%s1202_s8 + $0xe4] ss:$8 sps:$4 sm:$0xff]  }
  0x81   : > { %492 = vmatpush1.bf16.msra.mxu0 %v800_v6  ;;  %v836_v32 = vld [vmem:[%s1202_s8 + $0xe0] ss:$8 sps:$4 sm:$0xff]   ;;  %v837_v33 = vld [vmem:[%s1202_s8 + $0xf4] ss:$8 sps:$4 sm:$0xff]   ;;  %v839_v34 = vld [vmem:[%s1202_s8 + $0xf0] ss:$8 sps:$4 sm:$0xff]  }
  0x82   : > { %493 = vmatprep.subr.bf16.mxu0 %v801_v7  ;;  %v312_v38 = vsub.s32 0, %v311_v37  ;;  %v308_v39 = vld [vmem:[%s1215_s9] sm:$0x3]  ;;  %v316_v40 = vsub.s32 1, %v311_v37  ;;  %v541_v56 = vld [vmem:[%s236_s12 + $0x8] sm:$0xff]  ;;  %v1013_v59 = vmov 0.0  }
  0x83   : > { %v540_v55 = vld [vmem:[%s236_s12] sm:$0xff]  ;;  %p719_p6 = scmp.ne.s32.totalorder %s1118_s27, 1 }
  0x84   : > { %v313_v41 = vrot.slane %v308_v39, %v312_v38  ;;  %v317_v42 = vrot.slane %v308_v39, %v316_v40 }
  0x85   : > { %494 = vmatpush1.bf16.msra.mxu0 %v803_v8 }
  0x86   : > { %495 = vmatprep.subr.bf16.mxu0 %v804_v9 }
  0x89   : > { %496 = vmatpush1.bf16.msra.mxu0 %v806_v10 }
  0x8a   : > { %497 = vmatprep.subr.bf16.mxu0 %v807_v11 }
  0x8d   : > { %498 = vmatpush1.bf16.msra.mxu0 %v809_v12 }
  0x8e   : > { %499 = vmatprep.subr.bf16.mxu0 %v810_v13 }
  0x91   : > { %500 = vmatpush1.bf16.msra.mxu0 %v812_v16 }
  0x92   : > { %501 = vmatprep.subr.bf16.mxu0 %v813_v17 }
  0x95   : > { %502 = vmatpush1.bf16.msra.mxu0 %v815_v18 }
  0x96   : > { %503 = vmatprep.subr.bf16.mxu0 %v816_v19 }
  0x99   : > { %504 = vmatpush1.bf16.msra.mxu0 %v818_v20 }
  0x9a   : > { %505 = vmatprep.subr.bf16.mxu0 %v819_v21 }
  0x9d   : > { %506 = vmatpush1.bf16.msra.mxu0 %v821_v22 }
  0x9e   : > { %507 = vmatprep.subr.bf16.mxu0 %v822_v23 }
  0xa1   : > { %508 = vmatpush1.bf16.msra.mxu0 %v824_v24 }
  0xa2   : > { %509 = vmatprep.subr.bf16.mxu0 %v825_v25 }
  0xa5   : > { %510 = vmatpush1.bf16.msra.mxu0 %v827_v26 }
  0xa6   : > { %511 = vmatprep.subr.bf16.mxu0 %v828_v27 }
  0xa9   : > { %512 = vmatpush1.bf16.msra.mxu0 %v830_v28 }
  0xaa   : > { %513 = vmatprep.subr.bf16.mxu0 %v831_v29 }
  0xad   : > { %514 = vmatpush1.bf16.msra.mxu0 %v833_v30 }
  0xae   : > { %515 = vmatprep.subr.bf16.mxu0 %v834_v31 }
  0xb1   : > { %516 = vmatpush1.bf16.msra.mxu0 %v836_v32 }
  0xb2   : > { %517 = vmatprep.subr.bf16.mxu0 %v837_v33 }
  0xb5   : > { %518 = vmatpush1.bf16.msra.mxu0 %v839_v34 }
  0xb8   : > { %520 = vmatmul.mubr.bf16.vlgmr.msra.gmra.mrb[0].mxu0 %v680_v35 }
 0x18b   : > { %v521_v43 = vpop.f32.mrb[0].mxu0 }
 0x18c   : > { %v522_v44 = vadd.f32 %v521_v43, %v313_v41  ;;  %v523_v45 = vpop.f32.mrb[1].mxu0 }
 0x18d   : > { %v524_v46 = vadd.f32 %v523_v45, %v317_v42  ;;  %v525_v47 = vpop.f32.mrb[2].mxu0 }
 0x18e   : > { %v714_v48 = vmul.f32 -1.442695, %v522_v44  ;;  %v526_v49 = vpop.f32.mrb[3].mxu0 }
 0x18f   : > { %v715_v50 = vmul.f32 -1.442695, %v524_v46 }
 0x190   : > { %842 = vpow2.f32 %v714_v48 }
 0x191   : > { %844 = vpow2.f32 %v715_v50 }
 0x19a   : > { %v843_v51 = vpop.eup %842 }
 0x19b   : > { %v845_v52 = vpop.eup %844  ;;  %v534_v53 = vadd.f32 1.0, %v843_v51 }
 0x19c   : > { %v535_v54 = vadd.f32 1.0, %v845_v52 }
 0x19d   : > { %846 = vrcp.f32 %v534_v53 }
 0x19e   : > { %848 = vrcp.f32 %v535_v54 }
 0x1a7   : > { %v847_v57 = vpop.eup %846  ;;  %560 = sbr.rel (%p719_p6) target bundleno = 430 (0x1ae), region = 56 }
 0x1a8   : > { %v849_v58 = vpop.eup %848  ;;  %vm542_vm0 = vcmp.lt.f32.partialorder %v540_v55, %v847_v57 }
 0x1a9   : > { %v716_v60 = vsel %vm542_vm0, 1.0, %v1013_v59  ;;  %vm543_vm1 = vcmp.lt.f32.partialorder %v541_v56, %v849_v58 }
 0x1aa   : > { %v717_v61 = vsel %vm543_vm1, 1.0, %v1013_v59  ;;  %562 = vst [vmem:[#allocation9] sm:$0xff] (!%p719_p6), %v716_v60 }
 0x1ab   : > { %v726_v62 = vpack.c.bf16 %v717_v61, %v716_v60 }
 0x1ad   : > { %556 = vst [vmem:[#allocation2] sm:$0xff] %v726_v62 }
 0x1ae PF: > { %p753_p0 = scmp.eq.s32.totalorder %s1118_s27, 1  ;;  %s1014_s28 = smov [#allocation9]  }
 0x1af   : > { %s570_s13 = sshll.u32 %s1014_s28, 4  ;;  %s571_s13 = int_to_ptr.vmem [resolvable:$true] %s570_s13 }
 0x1b0   : > { %s938_s24 = scalar_lea.vmem %s571_s13, 128  ;;  %p945_p11 = scmp.lt.s32.totalorder %s571_s13, %s571_s13 }
 0x1b1   : > { %p939_p4 = scmp.ne.s32.totalorder %s571_s13, %s938_s24  ;;  %p946_p5 = scmp.lt.s32.totalorder %s938_s24, %s938_s24 }
 0x1b3   : > { %p940_p8 = pnand %p939_p4, %p753_p0  ;;  %p947_p7 = por %p946_p5, %p945_p11 }
 0x1b5   : > { %p941_p1 = pneg %p940_p8 }
 0x1b7   : > { %p948_p12 = pnand %p947_p7, %p941_p1 }
 0x1b9   : > { %951 = shalt.err (!%p948_p12)
}
 0x1ba   : > { %s952_s5 = scalar_lea.hbm %s1298_s4, 128 }
 0x1bb   : > { %p953_p9 = scmp.ne.s32.totalorder %s1298_s4, %s952_s5  ;;  %p958_p10 = scmp.lt.u32.totalorder %s952_s5, %s1298_s4 }
 0x1bd   : > { %p954_p2 = pnand %p953_p9, %p753_p0 }
 0x1bf   : > { %p955_p3 = pneg %p954_p2 }
 0x1c1   : > { %p960_p13 = pnand %p958_p10, %p955_p3 }
 0x1c3   : > { %963 = shalt.err (!%p960_p13)
}
 0x1c4   : > { %736 = dma.vmem_to_hbm [thread:$0]  (%p753_p0), %s571_s13, 128, %s1298_s4, [#allocation5]  }
 0x1c5   : > { %989 = dma.done.wait (%p753_p0), [#allocation5], 128  }
 0x1c6   : > { %991 = vsyncadd (%p753_p0), [#allocation5], 4294967168 }
 0x1c7 PF: > { %p16_p6 = scmp.ge.s32.totalorder %s1061_s19, 4   ;;  %s1317_s15 = smov %s998_s16 }
 0x1c8   : > { %s1318_s16 = smov %s1002_s17  ;;  %s1319_s17 = smov %s1071_s22 }
 0x1c9   : > { %s1320_s18 = smov %s1061_s19  ;;  %18 = sbr.rel (!%p16_p6) target bundleno = 5 (0x5), region = 100 }
 0x1d0   :  { %583 = vsyncpa [#allocation4], 1 }
 0x1d1   :  { %585 = vsyncpa [#allocation4 + $0x1], 1 }
 0x1d2   :  { %586 = vsyncpa [#allocation7], 1 }
 0x1d3   :  { %588 = vsyncpa [#allocation7 + $0x1], 1 }
 0x1d4   :  { %589 = vsyncpa [#allocation5], 1 }
 0x1d5   :  { %591 = vsyncpa [#allocation5 + $0x1], 1 }

</bundles_post_ra>
